<compile_context>
chip_gen: v7x
topology: tpu7x:2x2x1
jax: 0.10.0
libtpu: 0.0.40
codegen_flags: <defaults>
</compile_context>

<pallas_src>
import functools

import jax
import jax.numpy as jnp
from jax.experimental import pallas as pl
from jax.experimental.pallas import tpu as pltpu

LANE = 128


# ----------------------------------------------------------------------------
# Kernel
# ----------------------------------------------------------------------------
def _pf_vae_kernel(xe_ref, wblob_ref, bblob_ref, fblob_ref,
                   xout_ref, stats_ref, *, in_dim, z_dim, num_steps):
    dot = functools.partial(jnp.dot, preferred_element_type=jnp.float32)

    xe = xe_ref[...]            # (B, 128): [x | eps | 0]
    b = bblob_ref[...]          # (8, 128): padded bias rows
    f = fblob_ref[...]          # (Kp, 128): per row [wf | uf | bf | u.w | 0]

    def wblk(i):                # i-th 128x128 weight block (static row slice)
        return wblob_ref[i * LANE:(i + 1) * LANE, :]

    # ---- Encoder: Linear+ReLU x2, then fused (mu || sigma) head ----
    h = jnp.maximum(dot(xe, wblk(0)) + b[0:1, :], 0.0)
    h = jnp.maximum(dot(h, wblk(1)) + b[1:2, :], 0.0)
    head = dot(h, wblk(2)) + b[2:3, :]          # lanes [0:z)=mu, [z:2z)=sigma

    mu = head[:, 0:z_dim]
    sigma = head[:, z_dim:2 * z_dim]
    eps = xe[:, in_dim:in_dim + z_dim]

    # ---- Reparameterization trick (eps ~ U[0,1), matching torch.rand_like) ----
    z = mu + sigma * eps                        # (B, z_dim)

    # ---- Planar flow: z <- z + u*tanh(w.z+b); det = 1 + (1-tanh^2)*(u.w) ----
    batch = z.shape[0]
    sum_logdet = jnp.zeros((batch, 1), jnp.float32)
    for k in range(num_steps):                  # num_steps is small -> unrolled
        w_k = f[k:k + 1, 0:z_dim]                               # (1, z)
        u_k = f[k:k + 1, z_dim:2 * z_dim]                       # (1, z)
        b_k = f[k:k + 1, 2 * z_dim:2 * z_dim + 1]               # (1, 1)
        uw_k = f[k:k + 1, 2 * z_dim + 1:2 * z_dim + 2]          # (1, 1) = u.w
        lin = jnp.sum(z * w_k, axis=-1, keepdims=True) + b_k    # (B, 1)
        hk = jnp.tanh(lin)
        det = 1.0 + (1.0 - hk * hk) * uw_k                      # == 1 + u.psi
        sum_logdet = sum_logdet + jnp.log(jnp.abs(det) + 1e-8)
        z = z + u_k * hk

    # ---- Decoder: Linear+ReLU x3 (ReLU on last layer too, as in reference) ----
    d = jnp.maximum(dot(z, wblk(3)[0:z_dim, :]) + b[3:4, :], 0.0)
    d = jnp.maximum(dot(d, wblk(4)) + b[4:5, :], 0.0)
    d = jnp.maximum(dot(d, wblk(5)) + b[5:6, :], 0.0)

    # ---- Packed, lane-dense outputs ----
    xout_ref[...] = d                           # x_out lives in lanes [0:in_dim)
    lane = jax.lax.broadcasted_iota(jnp.int32, head.shape, 1)
    stats_ref[...] = jnp.where(lane == 2 * z_dim,
                               jnp.broadcast_to(sum_logdet, head.shape),
                               head)            # [mu | sigma | logdet | ...]


# ----------------------------------------------------------------------------
# Wrapper
# ----------------------------------------------------------------------------
@functools.partial(jax.jit, static_argnames=("in_dim", "z_dim", "num_steps"))
def planar_flow_vae_forward(x, eps, wblob, bblob, fblob, *,
                            in_dim, z_dim, num_steps):
    batch = x.shape[0]
    assert in_dim + z_dim <= LANE
    pad = jnp.zeros((batch, LANE - in_dim - z_dim), jnp.float32)
    xe = jnp.concatenate([x, eps, pad], axis=1)   # single lane-dense input slab

    kernel = functools.partial(_pf_vae_kernel, in_dim=in_dim, z_dim=z_dim,
                               num_steps=num_steps)
    vmem = pl.BlockSpec(memory_space=pltpu.MemorySpace.VMEM)
    out_shape = (jax.ShapeDtypeStruct((batch, LANE), jnp.float32),   # x_out slab
                 jax.ShapeDtypeStruct((batch, LANE), jnp.float32))   # stats slab

    xo, stats = pl.pallas_call(
        kernel,
        out_shape=out_shape,
        in_specs=[vmem] * 4,
        out_specs=(vmem, vmem),
    )(xe, wblob, bblob, fblob)

    x_out = xo[:, :in_dim]
    mu = stats[:, :z_dim]
    sigma = stats[:, z_dim:2 * z_dim]
    sum_logdet = stats[:, 2 * z_dim]
    return x_out, sum_logdet, mu, sigma


# ----------------------------------------------------------------------------
# Parameter construction (synthetic init) + packing into contiguous blobs
# ----------------------------------------------------------------------------
def make_params(key, in_dim, hiddens_dim, z_dim, num_steps):
    keys = jax.random.split(key, 16)

    def lin(k, fan_in, fan_out):
        scale = 1.0 / jnp.sqrt(jnp.float32(fan_in))
        w = jax.random.normal(k, (fan_in, fan_out), jnp.float32) * scale
        b = jnp.zeros((1, fan_out), jnp.float32)
        return w, b

    h1, h2 = hiddens_dim
    p = {}
    # Encoder: in_dim -> h1 -> h2, then mu/sigma heads -> z_dim
    p["w1"], p["b1"] = lin(keys[0], in_dim, h1)
    p["w2"], p["b2"] = lin(keys[1], h1, h2)
    p["wmu"], p["bmu"] = lin(keys[2], h2, z_dim)
    p["wsig"], p["bsig"] = lin(keys[3], h2, z_dim)
    # Planar flow params: (num_steps, z_dim) for w and u, (num_steps, 1) for b
    p["wf"] = 0.1 * jax.random.normal(keys[4], (num_steps, z_dim), jnp.float32)
    p["uf"] = 0.1 * jax.random.normal(keys[5], (num_steps, z_dim), jnp.float32)
    p["bf"] = jnp.zeros((num_steps, 1), jnp.float32)
    # Decoder: z_dim -> h2 -> h1 -> in_dim (hiddens reversed), all Linear+ReLU
    p["d1"], p["db1"] = lin(keys[6], z_dim, h2)
    p["d2"], p["db2"] = lin(keys[7], h2, h1)
    p["d3"], p["db3"] = lin(keys[8], h1, in_dim)
    return p


def pack_params(p, z_dim, num_steps):
    """Pack the 19 small arrays into 3 contiguous, 128-lane-padded blobs."""
    assert 2 * z_dim + 2 <= LANE

    def pad_w(w):
        assert w.shape[0] <= LANE and w.shape[1] <= LANE
        out = jnp.zeros((LANE, LANE), jnp.float32)
        return out.at[:w.shape[0], :w.shape[1]].set(w)

    def pad_b(bias):
        out = jnp.zeros((1, LANE), jnp.float32)
        return out.at[:, :bias.shape[1]].set(bias)

    whead = jnp.concatenate([p["wmu"], p["wsig"]], axis=1)   # fused mu||sigma head
    bhead = jnp.concatenate([p["bmu"], p["bsig"]], axis=1)

    wblob = jnp.concatenate(
        [pad_w(p["w1"]), pad_w(p["w2"]), pad_w(whead),
         pad_w(p["d1"]), pad_w(p["d2"]), pad_w(p["d3"])], axis=0)   # (768, 128)

    brows = [pad_b(p["b1"]), pad_b(p["b2"]), pad_b(bhead),
             pad_b(p["db1"]), pad_b(p["db2"]), pad_b(p["db3"])]
    brows.append(jnp.zeros((8 - len(brows), LANE), jnp.float32))
    bblob = jnp.concatenate(brows, axis=0)                          # (8, 128)

    kp = ((num_steps + 7) // 8) * 8
    uw = jnp.sum(p["uf"] * p["wf"], axis=-1, keepdims=True)         # (K, 1) = u.w
    fblob = jnp.zeros((kp, LANE), jnp.float32)
    fblob = fblob.at[:num_steps, 0:z_dim].set(p["wf"])
    fblob = fblob.at[:num_steps, z_dim:2 * z_dim].set(p["uf"])
    fblob = fblob.at[:num_steps, 2 * z_dim:2 * z_dim + 1].set(p["bf"])
    fblob = fblob.at[:num_steps, 2 * z_dim + 1:2 * z_dim + 2].set(uw)
    return wblob, bblob, fblob


# ----------------------------------------------------------------------------
# Plain-JAX reference of the same math (for numeric check)
# ----------------------------------------------------------------------------
def reference_forward(x, eps, p):
    relu = lambda v: jnp.maximum(v, 0.0)
    h = relu(x @ p["w1"] + p["b1"])
    h = relu(h @ p["w2"] + p["b2"])
    mu = h @ p["wmu"] + p["bmu"]
    sigma = h @ p["wsig"] + p["bsig"]
    z = mu + sigma * eps
    sum_logdet = jnp.zeros((x.shape[0],), jnp.float32)
    for k in range(p["wf"].shape[0]):
        w_k = p["wf"][k]
        u_k = p["uf"][k]
        b_k = p["bf"][k, 0]
        lin = z @ w_k + b_k
        hk = jnp.tanh(lin)
        psi = (1.0 - hk * hk)[:, None] * w_k[None, :]
        det = 1.0 + psi @ u_k
        sum_logdet = sum_logdet + jnp.log(jnp.abs(det) + 1e-8)
        z = z + u_k[None, :] * hk[:, None]
    d = relu(z @ p["d1"] + p["db1"])
    d = relu(d @ p["d2"] + p["db2"])
    d = relu(d @ p["d3"] + p["db3"])
    return d, sum_logdet, mu, sigma


if __name__ == "__main__":
    BATCH = 8
    IN_DIM = 32
    HIDDENS = [64, 32]
    Z_DIM = 16
    NUM_STEPS = 4

    key = jax.random.PRNGKey(0)
    k_x, k_eps, k_p = jax.random.split(key, 3)

    x = jax.random.normal(k_x, (BATCH, IN_DIM), jnp.float32)
    eps = jax.random.uniform(k_eps, (BATCH, Z_DIM), jnp.float32)  # torch.rand_like
    params = make_params(k_p, IN_DIM, HIDDENS, Z_DIM, NUM_STEPS)
    wblob, bblob, fblob = pack_params(params, Z_DIM, NUM_STEPS)

    x_out, sum_logdet, mu, sigma = planar_flow_vae_forward(
        x, eps, wblob, bblob, fblob,
        in_dim=IN_DIM, z_dim=Z_DIM, num_steps=NUM_STEPS)
    jax.block_until_ready((x_out, sum_logdet, mu, sigma))

    assert x_out.shape == (BATCH, IN_DIM)
    assert sum_logdet.shape == (BATCH,)
    assert mu.shape == (BATCH, Z_DIM)
    assert sigma.shape == (BATCH, Z_DIM)

    # Numeric check against the plain-JAX reference of identical math.
    r_x, r_ld, r_mu, r_sig = reference_forward(x, eps, params)
    for got, want in ((x_out, r_x), (sum_logdet, r_ld), (mu, r_mu), (sigma, r_sig)):
        err = float(jnp.max(jnp.abs(got - want)))
        assert err < 2e-3, f"kernel/reference mismatch: {err}"

    print("KERNEL_OK")
</pallas_src>

<mosaic_0001>
module attributes {stable_mosaic.version = 11 : i64} {
  func.func @_pf_vae_kernel(%arg0: memref<8x128xf32, #tpu.memory_space<vmem>>, %arg1: memref<768x128xf32, #tpu.memory_space<vmem>>, %arg2: memref<8x128xf32, #tpu.memory_space<vmem>>, %arg3: memref<8x128xf32, #tpu.memory_space<vmem>>, %arg4: memref<8x128xf32, #tpu.memory_space<vmem>>, %arg5: memref<8x128xf32, #tpu.memory_space<vmem>>) attributes {dimension_semantics = [], scalar_prefetch = 0 : i64, scratch_operands = 0 : i64, tpu.core_type = #tpu.core_type<tc>} {
    %c0 = arith.constant 0 : index
    %c0_0 = arith.constant 0 : index
    %0 = vector.load %arg0[%c0, %c0_0] : memref<8x128xf32, #tpu.memory_space<vmem>>, vector<8x128xf32>
    %c0_1 = arith.constant 0 : index
    %c0_2 = arith.constant 0 : index
    %1 = vector.load %arg2[%c0_1, %c0_2] : memref<8x128xf32, #tpu.memory_space<vmem>>, vector<8x128xf32>
    %c0_3 = arith.constant 0 : index
    %c0_4 = arith.constant 0 : index
    %2 = vector.load %arg3[%c0_3, %c0_4] : memref<8x128xf32, #tpu.memory_space<vmem>>, vector<8x128xf32>
    %c0_5 = arith.constant 0 : index
    %c0_6 = arith.constant 0 : index
    %3 = vector.load %arg1[%c0_5, %c0_6] : memref<768x128xf32, #tpu.memory_space<vmem>>, vector<128x128xf32>
    %cst = arith.constant dense<0.000000e+00> : vector<8x128xf32>
    %4 = tpu.matmul %0, %3, %cst {dimension_numbers = #tpu.dot_dimension_numbers<[1], [0], [0], [1], [0, 0, 1, 1], [], []>} : vector<8x128xf32>, vector<128x128xf32>, vector<8x128xf32> -> vector<8x128xf32>
    %5 = vector.extract_strided_slice %1 {offsets = [0, 0], sizes = [1, 128], strides = [1, 1]} : vector<8x128xf32> to vector<1x128xf32>
    %6 = vector.broadcast %5 : vector<1x128xf32> to vector<8x128xf32>
    %7 = arith.addf %4, %6 : vector<8x128xf32>
    %cst_7 = arith.constant 0.000000e+00 : f32
    %8 = vector.broadcast %cst_7 : f32 to vector<8x128xf32>
    %9 = arith.maximumf %7, %8 : vector<8x128xf32>
    %c128 = arith.constant 128 : index
    %c0_8 = arith.constant 0 : index
    %10 = vector.load %arg1[%c128, %c0_8] : memref<768x128xf32, #tpu.memory_space<vmem>>, vector<128x128xf32>
    %cst_9 = arith.constant dense<0.000000e+00> : vector<8x128xf32>
    %11 = tpu.matmul %9, %10, %cst_9 {dimension_numbers = #tpu.dot_dimension_numbers<[1], [0], [0], [1], [0, 0, 1, 1], [], []>} : vector<8x128xf32>, vector<128x128xf32>, vector<8x128xf32> -> vector<8x128xf32>
    %12 = vector.extract_strided_slice %1 {offsets = [1, 0], sizes = [1, 128], strides = [1, 1]} : vector<8x128xf32> to vector<1x128xf32>
    %13 = vector.broadcast %12 : vector<1x128xf32> to vector<8x128xf32>
    %14 = arith.addf %11, %13 : vector<8x128xf32>
    %cst_10 = arith.constant 0.000000e+00 : f32
    %15 = vector.broadcast %cst_10 : f32 to vector<8x128xf32>
    %16 = arith.maximumf %14, %15 : vector<8x128xf32>
    %c256 = arith.constant 256 : index
    %c0_11 = arith.constant 0 : index
    %17 = vector.load %arg1[%c256, %c0_11] : memref<768x128xf32, #tpu.memory_space<vmem>>, vector<128x128xf32>
    %cst_12 = arith.constant dense<0.000000e+00> : vector<8x128xf32>
    %18 = tpu.matmul %16, %17, %cst_12 {dimension_numbers = #tpu.dot_dimension_numbers<[1], [0], [0], [1], [0, 0, 1, 1], [], []>} : vector<8x128xf32>, vector<128x128xf32>, vector<8x128xf32> -> vector<8x128xf32>
    %19 = vector.extract_strided_slice %1 {offsets = [2, 0], sizes = [1, 128], strides = [1, 1]} : vector<8x128xf32> to vector<1x128xf32>
    %20 = vector.broadcast %19 : vector<1x128xf32> to vector<8x128xf32>
    %21 = arith.addf %18, %20 : vector<8x128xf32>
    %22 = vector.extract_strided_slice %21 {offsets = [0, 0], sizes = [8, 16], strides = [1, 1]} : vector<8x128xf32> to vector<8x16xf32>
    %23 = vector.extract_strided_slice %21 {offsets = [0, 16], sizes = [8, 16], strides = [1, 1]} : vector<8x128xf32> to vector<8x16xf32>
    %24 = vector.extract_strided_slice %0 {offsets = [0, 32], sizes = [8, 16], strides = [1, 1]} : vector<8x128xf32> to vector<8x16xf32>
    %25 = arith.mulf %23, %24 : vector<8x16xf32>
    %26 = arith.addf %22, %25 : vector<8x16xf32>
    %cst_13 = arith.constant 0.000000e+00 : f32
    %27 = vector.broadcast %cst_13 : f32 to vector<8x1xf32>
    %28 = vector.extract_strided_slice %2 {offsets = [0, 0], sizes = [1, 16], strides = [1, 1]} : vector<8x128xf32> to vector<1x16xf32>
    %29 = vector.extract_strided_slice %2 {offsets = [0, 16], sizes = [1, 16], strides = [1, 1]} : vector<8x128xf32> to vector<1x16xf32>
    %30 = vector.extract_strided_slice %2 {offsets = [0, 32], sizes = [1, 1], strides = [1, 1]} : vector<8x128xf32> to vector<1x1xf32>
    %31 = vector.extract_strided_slice %2 {offsets = [0, 33], sizes = [1, 1], strides = [1, 1]} : vector<8x128xf32> to vector<1x1xf32>
    %32 = vector.broadcast %28 : vector<1x16xf32> to vector<8x16xf32>
    %33 = arith.mulf %26, %32 : vector<8x16xf32>
    %cst_14 = arith.constant dense<0.000000e+00> : vector<8xf32>
    %34 = vector.multi_reduction <add>, %33, %cst_14 [1] : vector<8x16xf32> to vector<8xf32>
    %35 = vector.shape_cast %34 : vector<8xf32> to vector<8x1xf32>
    %36 = vector.broadcast %30 : vector<1x1xf32> to vector<8x1xf32>
    %37 = arith.addf %35, %36 : vector<8x1xf32>
    %38 = math.tanh %37 : vector<8x1xf32>
    %39 = arith.mulf %38, %38 : vector<8x1xf32>
    %cst_15 = arith.constant 1.000000e+00 : f32
    %40 = vector.broadcast %cst_15 : f32 to vector<8x1xf32>
    %41 = arith.subf %40, %39 : vector<8x1xf32>
    %42 = vector.broadcast %31 : vector<1x1xf32> to vector<8x1xf32>
    %43 = arith.mulf %41, %42 : vector<8x1xf32>
    %cst_16 = arith.constant 1.000000e+00 : f32
    %44 = vector.broadcast %cst_16 : f32 to vector<8x1xf32>
    %45 = arith.addf %44, %43 : vector<8x1xf32>
    %46 = math.absf %45 : vector<8x1xf32>
    %cst_17 = arith.constant 9.99999993E-9 : f32
    %47 = vector.broadcast %cst_17 : f32 to vector<8x1xf32>
    %48 = arith.addf %46, %47 : vector<8x1xf32>
    %49 = math.log %48 : vector<8x1xf32>
    %50 = arith.addf %27, %49 : vector<8x1xf32>
    %51 = vector.broadcast %29 : vector<1x16xf32> to vector<8x16xf32>
    %52 = vector.broadcast %38 : vector<8x1xf32> to vector<8x16xf32>
    %53 = arith.mulf %51, %52 : vector<8x16xf32>
    %54 = arith.addf %26, %53 : vector<8x16xf32>
    %55 = vector.extract_strided_slice %2 {offsets = [1, 0], sizes = [1, 16], strides = [1, 1]} : vector<8x128xf32> to vector<1x16xf32>
    %56 = vector.extract_strided_slice %2 {offsets = [1, 16], sizes = [1, 16], strides = [1, 1]} : vector<8x128xf32> to vector<1x16xf32>
    %57 = vector.extract_strided_slice %2 {offsets = [1, 32], sizes = [1, 1], strides = [1, 1]} : vector<8x128xf32> to vector<1x1xf32>
    %58 = vector.extract_strided_slice %2 {offsets = [1, 33], sizes = [1, 1], strides = [1, 1]} : vector<8x128xf32> to vector<1x1xf32>
    %59 = vector.broadcast %55 : vector<1x16xf32> to vector<8x16xf32>
    %60 = arith.mulf %54, %59 : vector<8x16xf32>
    %cst_18 = arith.constant dense<0.000000e+00> : vector<8xf32>
    %61 = vector.multi_reduction <add>, %60, %cst_18 [1] : vector<8x16xf32> to vector<8xf32>
    %62 = vector.shape_cast %61 : vector<8xf32> to vector<8x1xf32>
    %63 = vector.broadcast %57 : vector<1x1xf32> to vector<8x1xf32>
    %64 = arith.addf %62, %63 : vector<8x1xf32>
    %65 = math.tanh %64 : vector<8x1xf32>
    %66 = arith.mulf %65, %65 : vector<8x1xf32>
    %cst_19 = arith.constant 1.000000e+00 : f32
    %67 = vector.broadcast %cst_19 : f32 to vector<8x1xf32>
    %68 = arith.subf %67, %66 : vector<8x1xf32>
    %69 = vector.broadcast %58 : vector<1x1xf32> to vector<8x1xf32>
    %70 = arith.mulf %68, %69 : vector<8x1xf32>
    %cst_20 = arith.constant 1.000000e+00 : f32
    %71 = vector.broadcast %cst_20 : f32 to vector<8x1xf32>
    %72 = arith.addf %71, %70 : vector<8x1xf32>
    %73 = math.absf %72 : vector<8x1xf32>
    %cst_21 = arith.constant 9.99999993E-9 : f32
    %74 = vector.broadcast %cst_21 : f32 to vector<8x1xf32>
    %75 = arith.addf %73, %74 : vector<8x1xf32>
    %76 = math.log %75 : vector<8x1xf32>
    %77 = arith.addf %50, %76 : vector<8x1xf32>
    %78 = vector.broadcast %56 : vector<1x16xf32> to vector<8x16xf32>
    %79 = vector.broadcast %65 : vector<8x1xf32> to vector<8x16xf32>
    %80 = arith.mulf %78, %79 : vector<8x16xf32>
    %81 = arith.addf %54, %80 : vector<8x16xf32>
    %82 = vector.extract_strided_slice %2 {offsets = [2, 0], sizes = [1, 16], strides = [1, 1]} : vector<8x128xf32> to vector<1x16xf32>
    %83 = vector.extract_strided_slice %2 {offsets = [2, 16], sizes = [1, 16], strides = [1, 1]} : vector<8x128xf32> to vector<1x16xf32>
    %84 = vector.extract_strided_slice %2 {offsets = [2, 32], sizes = [1, 1], strides = [1, 1]} : vector<8x128xf32> to vector<1x1xf32>
    %85 = vector.extract_strided_slice %2 {offsets = [2, 33], sizes = [1, 1], strides = [1, 1]} : vector<8x128xf32> to vector<1x1xf32>
    %86 = vector.broadcast %82 : vector<1x16xf32> to vector<8x16xf32>
    %87 = arith.mulf %81, %86 : vector<8x16xf32>
    %cst_22 = arith.constant dense<0.000000e+00> : vector<8xf32>
    %88 = vector.multi_reduction <add>, %87, %cst_22 [1] : vector<8x16xf32> to vector<8xf32>
    %89 = vector.shape_cast %88 : vector<8xf32> to vector<8x1xf32>
    %90 = vector.broadcast %84 : vector<1x1xf32> to vector<8x1xf32>
    %91 = arith.addf %89, %90 : vector<8x1xf32>
    %92 = math.tanh %91 : vector<8x1xf32>
    %93 = arith.mulf %92, %92 : vector<8x1xf32>
    %cst_23 = arith.constant 1.000000e+00 : f32
    %94 = vector.broadcast %cst_23 : f32 to vector<8x1xf32>
    %95 = arith.subf %94, %93 : vector<8x1xf32>
    %96 = vector.broadcast %85 : vector<1x1xf32> to vector<8x1xf32>
    %97 = arith.mulf %95, %96 : vector<8x1xf32>
    %cst_24 = arith.constant 1.000000e+00 : f32
    %98 = vector.broadcast %cst_24 : f32 to vector<8x1xf32>
    %99 = arith.addf %98, %97 : vector<8x1xf32>
    %100 = math.absf %99 : vector<8x1xf32>
    %cst_25 = arith.constant 9.99999993E-9 : f32
    %101 = vector.broadcast %cst_25 : f32 to vector<8x1xf32>
    %102 = arith.addf %100, %101 : vector<8x1xf32>
    %103 = math.log %102 : vector<8x1xf32>
    %104 = arith.addf %77, %103 : vector<8x1xf32>
    %105 = vector.broadcast %83 : vector<1x16xf32> to vector<8x16xf32>
    %106 = vector.broadcast %92 : vector<8x1xf32> to vector<8x16xf32>
    %107 = arith.mulf %105, %106 : vector<8x16xf32>
    %108 = arith.addf %81, %107 : vector<8x16xf32>
    %109 = vector.extract_strided_slice %2 {offsets = [3, 0], sizes = [1, 16], strides = [1, 1]} : vector<8x128xf32> to vector<1x16xf32>
    %110 = vector.extract_strided_slice %2 {offsets = [3, 16], sizes = [1, 16], strides = [1, 1]} : vector<8x128xf32> to vector<1x16xf32>
    %111 = vector.extract_strided_slice %2 {offsets = [3, 32], sizes = [1, 1], strides = [1, 1]} : vector<8x128xf32> to vector<1x1xf32>
    %112 = vector.extract_strided_slice %2 {offsets = [3, 33], sizes = [1, 1], strides = [1, 1]} : vector<8x128xf32> to vector<1x1xf32>
    %113 = vector.broadcast %109 : vector<1x16xf32> to vector<8x16xf32>
    %114 = arith.mulf %108, %113 : vector<8x16xf32>
    %cst_26 = arith.constant dense<0.000000e+00> : vector<8xf32>
    %115 = vector.multi_reduction <add>, %114, %cst_26 [1] : vector<8x16xf32> to vector<8xf32>
    %116 = vector.shape_cast %115 : vector<8xf32> to vector<8x1xf32>
    %117 = vector.broadcast %111 : vector<1x1xf32> to vector<8x1xf32>
    %118 = arith.addf %116, %117 : vector<8x1xf32>
    %119 = math.tanh %118 : vector<8x1xf32>
    %120 = arith.mulf %119, %119 : vector<8x1xf32>
    %cst_27 = arith.constant 1.000000e+00 : f32
    %121 = vector.broadcast %cst_27 : f32 to vector<8x1xf32>
    %122 = arith.subf %121, %120 : vector<8x1xf32>
    %123 = vector.broadcast %112 : vector<1x1xf32> to vector<8x1xf32>
    %124 = arith.mulf %122, %123 : vector<8x1xf32>
    %cst_28 = arith.constant 1.000000e+00 : f32
    %125 = vector.broadcast %cst_28 : f32 to vector<8x1xf32>
    %126 = arith.addf %125, %124 : vector<8x1xf32>
    %127 = math.absf %126 : vector<8x1xf32>
    %cst_29 = arith.constant 9.99999993E-9 : f32
    %128 = vector.broadcast %cst_29 : f32 to vector<8x1xf32>
    %129 = arith.addf %127, %128 : vector<8x1xf32>
    %130 = math.log %129 : vector<8x1xf32>
    %131 = arith.addf %104, %130 : vector<8x1xf32>
    %132 = vector.broadcast %110 : vector<1x16xf32> to vector<8x16xf32>
    %133 = vector.broadcast %119 : vector<8x1xf32> to vector<8x16xf32>
    %134 = arith.mulf %132, %133 : vector<8x16xf32>
    %135 = arith.addf %108, %134 : vector<8x16xf32>
    %c384 = arith.constant 384 : index
    %c0_30 = arith.constant 0 : index
    %136 = vector.load %arg1[%c384, %c0_30] : memref<768x128xf32, #tpu.memory_space<vmem>>, vector<128x128xf32>
    %137 = vector.extract_strided_slice %136 {offsets = [0, 0], sizes = [16, 128], strides = [1, 1]} : vector<128x128xf32> to vector<16x128xf32>
    %cst_31 = arith.constant dense<0.000000e+00> : vector<8x128xf32>
    %138 = tpu.matmul %135, %137, %cst_31 {dimension_numbers = #tpu.dot_dimension_numbers<[1], [0], [0], [1], [0, 0, 1, 1], [], []>} : vector<8x16xf32>, vector<16x128xf32>, vector<8x128xf32> -> vector<8x128xf32>
    %139 = vector.extract_strided_slice %1 {offsets = [3, 0], sizes = [1, 128], strides = [1, 1]} : vector<8x128xf32> to vector<1x128xf32>
    %140 = vector.broadcast %139 : vector<1x128xf32> to vector<8x128xf32>
    %141 = arith.addf %138, %140 : vector<8x128xf32>
    %cst_32 = arith.constant 0.000000e+00 : f32
    %142 = vector.broadcast %cst_32 : f32 to vector<8x128xf32>
    %143 = arith.maximumf %141, %142 : vector<8x128xf32>
    %c512 = arith.constant 512 : index
    %c0_33 = arith.constant 0 : index
    %144 = vector.load %arg1[%c512, %c0_33] : memref<768x128xf32, #tpu.memory_space<vmem>>, vector<128x128xf32>
    %cst_34 = arith.constant dense<0.000000e+00> : vector<8x128xf32>
    %145 = tpu.matmul %143, %144, %cst_34 {dimension_numbers = #tpu.dot_dimension_numbers<[1], [0], [0], [1], [0, 0, 1, 1], [], []>} : vector<8x128xf32>, vector<128x128xf32>, vector<8x128xf32> -> vector<8x128xf32>
    %146 = vector.extract_strided_slice %1 {offsets = [4, 0], sizes = [1, 128], strides = [1, 1]} : vector<8x128xf32> to vector<1x128xf32>
    %147 = vector.broadcast %146 : vector<1x128xf32> to vector<8x128xf32>
    %148 = arith.addf %145, %147 : vector<8x128xf32>
    %cst_35 = arith.constant 0.000000e+00 : f32
    %149 = vector.broadcast %cst_35 : f32 to vector<8x128xf32>
    %150 = arith.maximumf %148, %149 : vector<8x128xf32>
    %c640 = arith.constant 640 : index
    %c0_36 = arith.constant 0 : index
    %151 = vector.load %arg1[%c640, %c0_36] : memref<768x128xf32, #tpu.memory_space<vmem>>, vector<128x128xf32>
    %cst_37 = arith.constant dense<0.000000e+00> : vector<8x128xf32>
    %152 = tpu.matmul %150, %151, %cst_37 {dimension_numbers = #tpu.dot_dimension_numbers<[1], [0], [0], [1], [0, 0, 1, 1], [], []>} : vector<8x128xf32>, vector<128x128xf32>, vector<8x128xf32> -> vector<8x128xf32>
    %153 = vector.extract_strided_slice %1 {offsets = [5, 0], sizes = [1, 128], strides = [1, 1]} : vector<8x128xf32> to vector<1x128xf32>
    %154 = vector.broadcast %153 : vector<1x128xf32> to vector<8x128xf32>
    %155 = arith.addf %152, %154 : vector<8x128xf32>
    %cst_38 = arith.constant 0.000000e+00 : f32
    %156 = vector.broadcast %cst_38 : f32 to vector<8x128xf32>
    %157 = arith.maximumf %155, %156 : vector<8x128xf32>
    %c0_39 = arith.constant 0 : index
    %c0_40 = arith.constant 0 : index
    %158 = vector.load %arg4[%c0_39, %c0_40] : memref<8x128xf32, #tpu.memory_space<vmem>>, vector<8x128xf32>
    tpu.vector_store %arg4[%c0_39, %c0_40], %157 {strides = array<i32>} : memref<8x128xf32, #tpu.memory_space<vmem>>, vector<8x128xf32>,
    %159 = tpu.iota {dimensions = array<i32: 1>} : vector<8x128xi32>
    %c32_i32 = arith.constant 32 : i32
    %160 = vector.broadcast %c32_i32 : i32 to vector<8x128xi32>
    %161 = arith.cmpi eq, %159, %160 : vector<8x128xi32>
    %162 = vector.shape_cast %131 : vector<8x1xf32> to vector<8x1xf32>
    %163 = vector.broadcast %162 : vector<8x1xf32> to vector<8x128xf32>
    %164 = arith.select %161, %163, %21 : vector<8x128xi1>, vector<8x128xf32>
    %c0_41 = arith.constant 0 : index
    %c0_42 = arith.constant 0 : index
    %165 = vector.load %arg5[%c0_41, %c0_42] : memref<8x128xf32, #tpu.memory_space<vmem>>, vector<8x128xf32>
    tpu.vector_store %arg5[%c0_41, %c0_42], %164 {strides = array<i32>} : memref<8x128xf32, #tpu.memory_space<vmem>>, vector<8x128xf32>,
    return
  }
}

</mosaic_0001>

<bundles_post_ra>
// kernel: planar_flow_vae_forward.1
= control target key start
LH: loop header
LB: loop body
LE: loop exit
PB: predicated region body
PF: predicated region fallthrough
CT: control target
= control target key end

     0   :  { %11 = vsyncpa [#allocation3], 0  ;;  %s1391_s0 = inlined_call_operand.vmem [shape: f32[8,128], index: 0, kind: input, shape index: {}]   ;;  %s1392_s1 = inlined_call_operand.hbm [shape: f32[768,128], index: 1, kind: input, shape index: {}]   ;;  %s1393_s2 = inlined_call_operand.vmem [shape: f32[8,128], index: 2, kind: input, shape index: {}]   ;;  %s1394_s3 = inlined_call_operand.vmem [shape: f32[8,128], index: 3, kind: input, shape index: {}]   ;;  %s1395_s4 = inlined_call_operand.hbm [shape: f32[8,128], index: 4, kind: output, shape index: {0}]   ;;  %s1396_s5 = inlined_call_operand.vmem [shape: f32[8,128], index: 5, kind: output, shape index: {1}]  }
   0x1   :  { %12 = vsyncpa [#allocation4], 0  ;;  %s1218_s18 = smov [#allocation2]   ;;  %s1170_s22 = scalar_lea.hbm %s1392_s1, 12288 }
   0x2   :  { %s20_s19 = sshll.u32 %s1218_s18, 4  ;;  %p1171_p0 = scmp.ne.s32.totalorder %s1392_s1, %s1170_s22  ;;  %s21_s19 = int_to_ptr.vmem [resolvable:$true] %s20_s19 }
   0x3   :  { %p1174_p1 = scmp.lt.u32.totalorder %s1170_s22, %s1392_s1 }
   0x5   :  { %p1176_p2 = pnand %p1174_p1, %p1171_p0 }
   0x7   :  { %1179 = shalt.err (!%p1176_p2)
}
   0x8   :  { %s1180_s27 = scalar_lea.vmem %s21_s19, 12288  ;;  %p1185_p4 = scmp.lt.s32.totalorder %s21_s19, %s21_s19 }
   0x9   :  { %p1181_p3 = scmp.ne.s32.totalorder %s21_s19, %s1180_s27  ;;  %p1186_p5 = scmp.lt.s32.totalorder %s1180_s27, %s1180_s27 }
   0xb   :  { %p1187_p6 = por %p1186_p5, %p1185_p4 }
   0xd   :  { %p1188_p7 = pnand %p1187_p6, %p1181_p3 }
   0xf   :  { %1191 = shalt.err (!%p1188_p7)
}
  0x10   :  { %s1219_s28 = smov 128   ;;  %s1220_s29 = smov 8  }
  0x11   :  { %26 = dma.hbm_to_vmem [thread:$0]  %s1392_s1, 12288, %s21_s19, [#allocation3], %s1219_s28, %s1219_s28, %s1220_s29  }
  0x12   :  { %1214 = dma.done.wait [#allocation3], 12288  }
  0x13   :  { %1215 = vsyncadd [#allocation3], 4294955008  ;;  %v1221_v0 = vmov 0.0|0.0   ;;  %vm1222_vm0 = vmmov 0   ;;  %v1223_v1 = vmov 0.0   ;;  %v37_v2 = vld [vmem:[#allocation2] sm:$0xff] }
  0x14   :  { %1019 = vmatprep.subr.bf16.mxu0 %v1221_v0  ;;  %869 = vmatprep.mubr.msk.f32.mxu0 %vm1222_vm0, %v1223_v1  ;;  %v38_v3 = vld [vmem:[#allocation2 + $0x8] sm:$0xff]  ;;  %v39_v4 = vld [vmem:[#allocation2 + $0x10] sm:$0xff]  ;;  %v40_v6 = vld [vmem:[#allocation2 + $0x18] sm:$0xff]  ;;  %s1224_s9 = smov 112   ;;  %vm324_vm1 = vcmask 130048  }
  0x15   :  { %1043 = vmatprep.subr.bf16.mxu1 %v1221_v0  ;;  %904 = vmatprep.mubr.msk.f32.mxu1 %vm1222_vm0, %v1223_v1  ;;  %v1020_v5 = vpack.c.bf16 %v38_v3, %v37_v2  ;;  %v1023_v7 = vpack.c.bf16 %v40_v6, %v39_v4  ;;  %v41_v8 = vld [vmem:[#allocation2 + $0x20] sm:$0xff]  ;;  %v42_v9 = vld [vmem:[#allocation2 + $0x28] sm:$0xff]  ;;  %v130_v12 = vld [vmem:[#allocation2 + $0x90] sm:$0xff] }
  0x16   :  { %v128_v10 = vld [vmem:[#allocation2 + $0x80] sm:$0xff]  ;;  %v129_v11 = vld [vmem:[#allocation2 + $0x88] sm:$0xff]  ;;  %v131_v13 = vld [vmem:[#allocation2 + $0x98] sm:$0xff]  ;;  %v1026_v14 = vpack.c.bf16 %v42_v9, %v41_v8 }
  0x17   :  { %1021 = vmatpush3.bf16.msra.mxu0 %v1020_v5  ;;  %v1044_v15 = vpack.c.bf16 %v129_v11, %v128_v10  ;;  %v43_v16 = vld [vmem:[#allocation2 + $0x30] sm:$0xff]  ;;  %v44_v17 = vld [vmem:[#allocation2 + $0x38] sm:$0xff]  ;;  %v1047_v18 = vpack.c.bf16 %v131_v13, %v130_v12  ;;  %v132_v19 = vld [vmem:[#allocation2 + $0xa0] sm:$0xff]  ;;  %v53_v10 = vlaneseq }
  0x18   :  { %1022 = vmatprep.subr.bf16.mxu0 %v1221_v0  ;;  %v133_v20 = vld [vmem:[#allocation2 + $0xa8] sm:$0xff]  ;;  %v1029_v21 = vpack.c.bf16 %v44_v17, %v43_v16  ;;  %v45_v22 = vld [vmem:[#allocation2 + $0x40] sm:$0xff]  ;;  %v134_v25 = vld [vmem:[#allocation2 + $0xb0] sm:$0xff] }
  0x19   :  { %1045 = vmatpush3.bf16.msra.mxu1 %v1044_v15  ;;  %v46_v23 = vld [vmem:[#allocation2 + $0x48] sm:$0xff]  ;;  %v1050_v24 = vpack.c.bf16 %v133_v20, %v132_v19  ;;  %v135_v26 = vld [vmem:[#allocation2 + $0xb8] sm:$0xff]  ;;  %v47_v28 = vld [vmem:[#allocation2 + $0x50] sm:$0xff]  ;;  %v1305_v11 = vshrl.u32 %v53_v10, 7 }
  0x1a   :  { %1046 = vmatprep.subr.bf16.mxu1 %v1221_v0  ;;  %v1032_v27 = vpack.c.bf16 %v46_v23, %v45_v22  ;;  %v48_v29 = vld [vmem:[#allocation2 + $0x58] sm:$0xff]  ;;  %v1053_v30 = vpack.c.bf16 %v135_v26, %v134_v25  ;;  %v136_v31 = vld [vmem:[#allocation2 + $0xc0] sm:$0xff]  ;;  %v137_v32 = vld [vmem:[#allocation2 + $0xc8] sm:$0xff] }
  0x1b   :  { %1024 = vmatpush3.bf16.msra.mxu0 %v1023_v7  ;;  %v1035_v33 = vpack.c.bf16 %v48_v29, %v47_v28  ;;  %v49_v34 = vld [vmem:[#allocation2 + $0x60] sm:$0xff]  ;;  %v50_v35 = vld [vmem:[#allocation2 + $0x68] sm:$0xff]  ;;  %v1056_v36 = vpack.c.bf16 %v137_v32, %v136_v31  ;;  %v138_v37 = vld [vmem:[#allocation2 + $0xd0] sm:$0xff]  ;;  %v55_v12 = vsub.s32 0, %v1305_v11  ;;  %v146_v22 = vsub.s32 1, %v1305_v11 }
  0x1c   :  { %1025 = vmatprep.subr.bf16.mxu0 %v1221_v0  ;;  %v139_v38 = vld [vmem:[#allocation2 + $0xd8] sm:$0xff]  ;;  %v1038_v39 = vpack.c.bf16 %v50_v35, %v49_v34  ;;  %v51_v40 = vld [vmem:[#allocation2 + $0x70] sm:$0xff]  ;;  %v140_v43 = vld [vmem:[#allocation2 + $0xe0] sm:$0xff]  ;;  %v237_v28 = vsub.s32 2, %v1305_v11 }
  0x1d   :  { %1048 = vmatpush3.bf16.msra.mxu1 %v1047_v18  ;;  %v52_v41 = vld [vmem:[#allocation2 + $0x78] sm:$0xff]  ;;  %v1059_v42 = vpack.c.bf16 %v139_v38, %v138_v37  ;;  %v141_v44 = vld [vmem:[#allocation2 + $0xe8] sm:$0xff]  ;;  %v34_v47 = vld [vmem:[%s1391_s0] sm:$0xff] }
  0x1e   :  { %1049 = vmatprep.subr.bf16.mxu1 %v1221_v0  ;;  %v1041_v45 = vpack.c.bf16 %v52_v41, %v51_v40  ;;  %v1062_v46 = vpack.c.bf16 %v141_v44, %v140_v43  ;;  %v142_v48 = vld [vmem:[#allocation2 + $0xf0] sm:$0xff]  ;;  %v143_v49 = vld [vmem:[#allocation2 + $0xf8] sm:$0xff]  ;;  %v219_v51 = vld [vmem:[#allocation2 + $0x100] sm:$0xff]  ;;  %310 = vrot.lane.b32.xlu0 %v34_v47, %s1224_s9  ;;  %v1225_v41 = vmov 32  }
  0x1f   :  { %1027 = vmatpush3.bf16.msra.mxu0 %v1026_v14  ;;  %v1065_v50 = vpack.c.bf16 %v143_v49, %v142_v48  ;;  %v220_v52 = vld [vmem:[#allocation2 + $0x108] sm:$0xff]  ;;  %v221_v53 = vld [vmem:[#allocation2 + $0x110] sm:$0xff]  ;;  %v222_v55 = vld [vmem:[#allocation2 + $0x118] sm:$0xff]  ;;  %1152 = vset.pattern.permute.xlu1 %v1225_v41 }
  0x20   :  { %1028 = vmatprep.subr.bf16.mxu0 %v1221_v0  ;;  %v1068_v54 = vpack.c.bf16 %v220_v52, %v219_v51  ;;  %v1071_v56 = vpack.c.bf16 %v222_v55, %v221_v53  ;;  %v223_v57 = vld [vmem:[#allocation2 + $0x120] sm:$0xff]  ;;  %v224_v58 = vld [vmem:[#allocation2 + $0x128] sm:$0xff]  ;;  %v225_v60 = vld [vmem:[#allocation2 + $0x130] sm:$0xff]  ;;  %1153 = vset.pattern.permute.xlu0 %v1225_v41 }
  0x21   :  { %1051 = vmatpush3.bf16.msra.mxu1 %v1050_v24  ;;  %v1074_v59 = vpack.c.bf16 %v224_v58, %v223_v57  ;;  %v226_v61 = vld [vmem:[#allocation2 + $0x138] sm:$0xff]  ;;  %v227_v63 = vld [vmem:[#allocation2 + $0x140] sm:$0xff]  ;;  %v228_v2 = vld [vmem:[#allocation2 + $0x148] sm:$0xff] }
  0x22   :  { %1052 = vmatprep.subr.bf16.mxu1 %v1221_v0  ;;  %v1077_v62 = vpack.c.bf16 %v226_v61, %v225_v60  ;;  %v1080_v3 = vpack.c.bf16 %v228_v2, %v227_v63  ;;  %v229_v4 = vld [vmem:[#allocation2 + $0x150] sm:$0xff]  ;;  %v230_v5 = vld [vmem:[#allocation2 + $0x158] sm:$0xff]  ;;  %v231_v7 = vld [vmem:[#allocation2 + $0x160] sm:$0xff] }
  0x23   :  { %1030 = vmatpush3.bf16.msra.mxu0 %v1029_v21  ;;  %v1083_v6 = vpack.c.bf16 %v230_v5, %v229_v4  ;;  %v232_v8 = vld [vmem:[#allocation2 + $0x168] sm:$0xff]  ;;  %v1311_v13 = vld [vmem:[%s1393_s2] sm:$0xff]  ;;  %v233_v19 = vld [vmem:[#allocation2 + $0x170] sm:$0xff]  ;;  %v424_v5 = vsub.s32 3, %v1305_v11 }
  0x24   :  { %1031 = vmatprep.subr.bf16.mxu0 %v1221_v0  ;;  %v1086_v9 = vpack.c.bf16 %v232_v8, %v231_v7  ;;  %v56_v14 = vrot.slane %v1311_v13, %v55_v12  ;;  %v234_v20 = vld [vmem:[#allocation2 + $0x178] sm:$0xff]  ;;  %v147_v23 = vrot.slane %v1311_v13, %v146_v22  ;;  %v238_v29 = vrot.slane %v1311_v13, %v237_v28  ;;  %v36_v35 = vld [vmem:[%s1394_s3] sm:$0xff]  ;;  %s1226_s3 = smov 127  }
  0x25   :  { %1054 = vmatpush3.bf16.msra.mxu1 %v1053_v30  ;;  %v1089_v21 = vpack.c.bf16 %v234_v20, %v233_v19  ;;  %v391_v57 = vrot.slane %v36_v35, %v237_v28 }
  0x26   :  { %1055 = vmatprep.subr.bf16.mxu1 %v1221_v0 }
  0x27   :  { %1033 = vmatpush3.bf16.msra.mxu0 %v1032_v27 }
  0x28   :  { %1034 = vmatprep.subr.bf16.mxu0 %v1221_v0 }
  0x29   :  { %1057 = vmatpush3.bf16.msra.mxu1 %v1056_v36  ;;  %v1331_v36 = vrot.slane %v36_v35, %v55_v12 }
  0x2a   :  { %1058 = vmatprep.subr.bf16.mxu1 %v1221_v0 }
  0x2b   :  { %1036 = vmatpush3.bf16.msra.mxu0 %v1035_v33 }
  0x2c   :  { %1037 = vmatprep.subr.bf16.mxu0 %v1221_v0 }
  0x2d   :  { %1060 = vmatpush3.bf16.msra.mxu1 %v1059_v42 }
  0x2e   :  { %1061 = vmatprep.subr.bf16.mxu1 %v1221_v0 }
  0x2f   :  { %1039 = vmatpush3.bf16.msra.mxu0 %v1038_v39 }
  0x30   :  { %1040 = vmatprep.subr.bf16.mxu0 %v1221_v0 }
  0x31   :  { %1063 = vmatpush3.bf16.msra.mxu1 %v1062_v46 }
  0x32   :  { %1064 = vmatprep.subr.bf16.mxu1 %v1221_v0 }
  0x33   :  { %1042 = vmatpush3.bf16.msra.mxu0 %v1041_v45 }
  0x34   :  { %1067 = vmatprep.subr.bf16.mxu0 %v1221_v0 }
  0x35   :  { %1066 = vmatpush3.bf16.msra.mxu1 %v1065_v50 }
  0x36   :  { %870 = vmatmul.mubr.f32.vlgmr.msra.gmra.mrb[0].mxu0 %v34_v47  ;;  %1091 = vmatprep.subr.bf16.mxu1 %v1221_v0  ;;  %v357_v47 = vrot.slane %v36_v35, %v146_v22 }
  0x37   :  { %939 = vmatprep.mubr.msk.f32.mxu0 %vm1222_vm0, %v1223_v1  ;;  %1069 = vmatpush3.bf16.msra.mxu0 %v1068_v54 }
  0x38   :  { %1070 = vmatprep.subr.bf16.mxu0 %v1221_v0 }
  0x3b   :  { %1072 = vmatpush3.bf16.msra.mxu0 %v1071_v56 }
  0x3c   :  { %1073 = vmatprep.subr.bf16.mxu0 %v1221_v0 }
  0x3f   :  { %1075 = vmatpush3.bf16.msra.mxu0 %v1074_v59 }
  0x40   :  { %1076 = vmatprep.subr.bf16.mxu0 %v1221_v0 }
  0x43   :  { %1078 = vmatpush3.bf16.msra.mxu0 %v1077_v62 }
  0x44   :  { %1079 = vmatprep.subr.bf16.mxu0 %v1221_v0 }
  0x47   :  { %1081 = vmatpush3.bf16.msra.mxu0 %v1080_v3 }
  0x48   :  { %1082 = vmatprep.subr.bf16.mxu0 %v1221_v0 }
  0x4b   :  { %1084 = vmatpush3.bf16.msra.mxu0 %v1083_v6  ;;  %v425_v6 = vrot.slane %v36_v35, %v424_v5 }
  0x4c   :  { %1085 = vmatprep.subr.bf16.mxu0 %v1221_v0 }
  0x4f   :  { %1087 = vmatpush3.bf16.msra.mxu0 %v1086_v9 }
  0x50   :  { %1088 = vmatprep.subr.bf16.mxu0 %v1221_v0 }
  0x53   :  { %1090 = vmatpush3.bf16.msra.mxu0 %v1089_v21 }
  0x54   :  { %1118 = vmatprep.subr.bf16.mxu0 %v1221_v0 }
  0x90   :  { %v311_v31 = vpop.permute.xlu0 %310 }
 0x109   :  { %v123_v15 = vpop.f32.mrb[0].mxu0 }
 0x10a   :  { %v124_v16 = vadd.f32 %v123_v15, %v56_v14  ;;  %v871_v17 = vpop.f32.mrb[1].mxu0 }
 0x10b   :  { %v456_v17 = vld [vmem:[#allocation2 + $0x180] sm:$0xff] }
 0x10c   :  { %v127_v18 = vmax.f32 %v124_v16, 0.0 }
 0x10e   :  { %905 = vmatmul.mubr.f32.vlgmr.msra.gmra.mrb[0].mxu1 %v127_v18  ;;  %v457_v18 = vld [vmem:[#allocation2 + $0x188] sm:$0xff] }
 0x10f   :  { %946 = vmatprep.mubr.msk.f32.mxu1 %vm1222_vm0, %v1223_v1  ;;  %v1092_v19 = vpack.c.bf16 %v457_v18, %v456_v17  ;;  %v544_v17 = vld [vmem:[#allocation2 + $0x240] sm:$0xff]  ;;  %v545_v18 = vld [vmem:[#allocation2 + $0x248] sm:$0xff] }
 0x111   :  { %1093 = vmatpush3.bf16.msra.mxu1 %v1092_v19  ;;  %v1107_v19 = vpack.c.bf16 %v545_v18, %v544_v17 }
 0x112   :  { %1094 = vmatprep.subr.bf16.mxu1 %v1221_v0 }
 0x1e1   :  { %v214_v24 = vpop.f32.mrb[0].mxu1 }
 0x1e2   :  { %v215_v25 = vadd.f32 %v214_v24, %v147_v23  ;;  %v906_v26 = vpop.f32.mrb[1].mxu1 }
 0x1e4   :  { %v218_v27 = vmax.f32 %v215_v25, 0.0 }
 0x1e6   :  { %940 = vmatmul.mubr.f32.vlgmr.msra.gmra.mrb[2].mxu0 %v218_v27 }
 0x1e7   :  { %1016 = vmatprep.mubr.msk.f32.mxu0 %vm1222_vm0, %v1223_v1 }
 0x2b9   :  { %v305_v30 = vpop.f32.mrb[2].mxu0 }
 0x2ba   :  { %v1324_v32 = vadd.f32 %v305_v30, %v238_v29  ;;  %v941_v33 = vpop.f32.mrb[3].mxu0 }
 0x2bc   :  { %v313_v34 = vmul.f32 %v311_v31, %v1324_v32 }
 0x2be   :  { %315 = vrot.lane.b32.xlu0 %v313_v34, %s1224_s9 }
 0x330   :  { %v316_v37 = vpop.permute.xlu0 %315 }
 0x331   :  { %v318_v38 = vadd.f32 %v316_v37, %v1324_v32 }
 0x333   :  { %v323_v39 = vmul.f32 %v1331_v36, %v318_v38 }
 0x335   :  { %v325_v40 = vsel %vm324_vm1, %v323_v39, 0.0 }
 0x336   :  { %326 = vadd.xlane.f32.xlu1 %v325_v40 }
 0x3c3   :  { %v327_v42 = vpop.xlane.xlu1 %326 }
 0x3c4   :  { %v328_v43 = vadd.f32 %v327_v42, %v1331_v36 }
 0x3c6   :  { %1154 = vtanh.f32 %v328_v43 }
 0x3d0   :  { %v1155_v44 = vpop.eup %1154 }
 0x3d1   :  { %345 = vperm.xlu1 %1152, %v1155_v44   ;;  %v330_v22 = vmul.f32 %v1155_v44, %v1155_v44 }
 0x3d3   :  { %v331_v25 = vsub.f32 1.0, %v330_v22 }
 0x450   :  { %v346_v45 = vpop.permute.xlu1 %345 }
 0x451   :  { %v348_v46 = vmul.f32 %v346_v45, %v1331_v36 }
 0x453   :  { %350 = vrot.lane.b32.xlu0 %v348_v46, %s1224_s9 }
 0x4c5   :  { %v351_v48 = vpop.permute.xlu0 %350 }
 0x4c6   :  { %v353_v49 = vadd.f32 %v351_v48, %v318_v38 }
 0x4c8   :  { %v358_v50 = vmul.f32 %v357_v47, %v353_v49 }
 0x4ca   :  { %v359_v51 = vsel %vm324_vm1, %v358_v50, 0.0 }
 0x4cb   :  { %360 = vadd.xlane.f32.xlu0 %v359_v51 }
 0x558   :  { %v361_v52 = vpop.xlane.xlu0 %360 }
 0x559   :  { %v362_v53 = vadd.f32 %v361_v52, %v357_v47 }
 0x55b   :  { %1156 = vtanh.f32 %v362_v53 }
 0x565   :  { %v1157_v54 = vpop.eup %1156 }
 0x566   :  { %379 = vperm.xlu1 %1152, %v1157_v54   ;;  %v364_v26 = vmul.f32 %v1157_v54, %v1157_v54 }
 0x568   :  { %v365_v30 = vsub.f32 1.0, %v364_v26  ;;  %v550_v26 = vld [vmem:[#allocation2 + $0x270] sm:$0xff] }
 0x5e5   :  { %v380_v55 = vpop.permute.xlu1 %379 }
 0x5e6   :  { %v382_v56 = vmul.f32 %v380_v55, %v357_v47 }
 0x5e8   :  { %384 = vrot.lane.b32.xlu1 %v382_v56, %s1224_s9 }
 0x65a   :  { %v385_v58 = vpop.permute.xlu1 %384 }
 0x65b   :  { %v387_v59 = vadd.f32 %v385_v58, %v353_v49 }
 0x65d   :  { %v392_v60 = vmul.f32 %v391_v57, %v387_v59 }
 0x65f   :  { %v393_v61 = vsel %vm324_vm1, %v392_v60, 0.0 }
 0x660   :  { %394 = vadd.xlane.f32.xlu1 %v393_v61 }
 0x6ed   :  { %v395_v62 = vpop.xlane.xlu1 %394 }
 0x6ee   :  { %v396_v63 = vadd.f32 %v395_v62, %v391_v57 }
 0x6f0   :  { %1158 = vtanh.f32 %v396_v63  ;;  %v536_v63 = vld [vmem:[#allocation2 + $0x200] sm:$0xff] }
 0x6fa   :  { %v1159_v2 = vpop.eup %1158 }
 0x6fb   :  { %413 = vperm.xlu0 %1153, %v1159_v2   ;;  %v398_v31 = vmul.f32 %v1159_v2, %v1159_v2  ;;  %v537_v2 = vld [vmem:[#allocation2 + $0x208] sm:$0xff] }
 0x6fd   :  { %v399_v38 = vsub.f32 1.0, %v398_v31  ;;  %v629_v31 = vld [vmem:[#allocation2 + $0x290] sm:$0xff] }
 0x77a   :  { %v414_v3 = vpop.permute.xlu0 %413 }
 0x77b   :  { %v416_v4 = vmul.f32 %v414_v3, %v391_v57  ;;  %v538_v3 = vld [vmem:[#allocation2 + $0x210] sm:$0xff] }
 0x77d   :  { %418 = vrot.lane.b32.xlu1 %v416_v4, %s1224_s9  ;;  %v1095_v4 = vpack.c.bf16 %v537_v2, %v536_v63 }
 0x7ef   :  { %v419_v7 = vpop.permute.xlu1 %418 }
 0x7f0   :  { %v421_v8 = vadd.f32 %v419_v7, %v387_v59 }
 0x7f2   :  { %v426_v9 = vmul.f32 %v425_v6, %v421_v8 }
 0x7f4   :  { %v427_v12 = vsel %vm324_vm1, %v426_v9, 0.0  ;;  %v541_v9 = vld [vmem:[#allocation2 + $0x228] sm:$0xff] }
 0x7f5   :  { %428 = vadd.xlane.f32.xlu1 %v427_v12 }
 0x882   :  { %v429_v14 = vpop.xlane.xlu1 %428 }
 0x883   :  { %v430_v15 = vadd.f32 %v429_v14, %v425_v6  ;;  %v542_v14 = vld [vmem:[#allocation2 + $0x230] sm:$0xff] }
 0x885   :  { %1160 = vtanh.f32 %v430_v15  ;;  %v543_v15 = vld [vmem:[#allocation2 + $0x238] sm:$0xff] }
 0x88f   :  { %v1161_v16 = vpop.eup %1160 }
 0x890   :  { %447 = vperm.xlu0 %1153, %v1161_v16   ;;  %v432_v39 = vmul.f32 %v1161_v16, %v1161_v16  ;;  %v1104_v16 = vpack.c.bf16 %v543_v15, %v542_v14 }
 0x892   :  { %v433_v45 = vsub.f32 1.0, %v432_v39  ;;  %v633_v39 = vld [vmem:[#allocation2 + $0x2b0] sm:$0xff] }
 0x90f   :  { %v448_v20 = vpop.permute.xlu0 %447 }
 0x910   :  { %v450_v21 = vmul.f32 %v448_v20, %v425_v6  ;;  %v546_v20 = vld [vmem:[#allocation2 + $0x250] sm:$0xff] }
 0x912   :  { %452 = vrot.lane.b32.xlu0 %v450_v21, %s1224_s9  ;;  %v547_v21 = vld [vmem:[#allocation2 + $0x258] sm:$0xff] }
 0x913   :  { %v1110_v22 = vpack.c.bf16 %v547_v21, %v546_v20 }
 0x916   :  { %333 = vrot.lane.b32.xlu0 %v1331_v36, %s1226_s3 }
 0x91a   :  { %367 = vrot.lane.b32.xlu0 %v357_v47, %s1226_s3 }
 0x91e   :  { %401 = vrot.lane.b32.xlu0 %v391_v57, %s1226_s3 }
 0x922   :  { %435 = vrot.lane.b32.xlu0 %v425_v6, %s1226_s3  ;;  %v539_v6 = vld [vmem:[#allocation2 + $0x218] sm:$0xff] }
 0x923   :  { %v1098_v7 = vpack.c.bf16 %v539_v6, %v538_v3 }
 0x984   :  { %v453_v23 = vpop.permute.xlu0 %452 }
 0x985   :  { %v455_v24 = vadd.f32 %v453_v23, %v421_v8  ;;  %v540_v8 = vld [vmem:[#allocation2 + $0x220] sm:$0xff] }
 0x986   :  { %v1101_v12 = vpack.c.bf16 %v541_v9, %v540_v8  ;;  %v548_v23 = vld [vmem:[#allocation2 + $0x260] sm:$0xff] }
 0x987   :  { %947 = vmatmul.mubr.msk.f32.vlgmr.msra.gmra.mrb[2].mxu1 %vm324_vm1, %v455_v24  ;;  %v549_v24 = vld [vmem:[#allocation2 + $0x268] sm:$0xff] }
 0x988   :  { %v334_v27 = vpop.permute.xlu0 %333  ;;  %981 = vmatprep.mubr.msk.f32.mxu1 %vm1222_vm0, %v1223_v1  ;;  %1096 = vmatpush3.bf16.msra.mxu1 %v1095_v4 }
 0x989   :  { %v336_v28 = vmul.f32 %v334_v27, %v331_v25  ;;  %1097 = vmatprep.subr.bf16.mxu1 %v1221_v0  ;;  %v1113_v25 = vpack.c.bf16 %v549_v24, %v548_v23  ;;  %v551_v27 = vld [vmem:[#allocation2 + $0x278] sm:$0xff] }
 0x98b   :  { %v337_v29 = vadd.f32 1.0, %v336_v28  ;;  %v1116_v28 = vpack.c.bf16 %v551_v27, %v550_v26 }
 0x98c   :  { %v368_v33 = vpop.permute.xlu0 %367  ;;  %1099 = vmatpush3.bf16.msra.mxu1 %v1098_v7 }
 0x98d   :  { %v338_v34 = vand.u32 2147483647, %v337_v29  ;;  %v370_v35 = vmul.f32 %v368_v33, %v365_v30  ;;  %1100 = vmatprep.subr.bf16.mxu1 %v1221_v0  ;;  %v627_v29 = vld [vmem:[#allocation2 + $0x280] sm:$0xff]  ;;  %v628_v30 = vld [vmem:[#allocation2 + $0x288] sm:$0xff] }
 0x98e   :  { %v1119_v33 = vpack.c.bf16 %v628_v30, %v627_v29 }
 0x98f   :  { %v339_v36 = vadd.f32 1e-08, %v338_v34  ;;  %v371_v37 = vadd.f32 1.0, %v370_v35  ;;  %v630_v34 = vld [vmem:[#allocation2 + $0x298] sm:$0xff] }
 0x990   :  { %v402_v40 = vpop.permute.xlu0 %401  ;;  %1102 = vmatpush3.bf16.msra.mxu1 %v1101_v12  ;;  %1120 = vmatpush3.bf16.msra.mxu0 %v1119_v33  ;;  %v1122_v35 = vpack.c.bf16 %v630_v34, %v629_v31 }
 0x991   :  { %v372_v41 = vand.u32 2147483647, %v371_v37  ;;  %v404_v42 = vmul.f32 %v402_v40, %v399_v38  ;;  %1162 = vlog2.f32 %v339_v36  ;;  %1103 = vmatprep.subr.bf16.mxu1 %v1221_v0  ;;  %1121 = vmatprep.subr.bf16.mxu0 %v1221_v0  ;;  %v631_v36 = vld [vmem:[#allocation2 + $0x2a0] sm:$0xff]  ;;  %v632_v37 = vld [vmem:[#allocation2 + $0x2a8] sm:$0xff]  ;;  %v634_v40 = vld [vmem:[#allocation2 + $0x2b8] sm:$0xff] }
 0x992   :  { %v1125_v38 = vpack.c.bf16 %v632_v37, %v631_v36 }
 0x993   :  { %v373_v43 = vadd.f32 1e-08, %v372_v41  ;;  %v405_v44 = vadd.f32 1.0, %v404_v42  ;;  %v1128_v41 = vpack.c.bf16 %v634_v40, %v633_v39  ;;  %v635_v42 = vld [vmem:[#allocation2 + $0x2c0] sm:$0xff] }
 0x994   :  { %v436_v46 = vpop.permute.xlu0 %435  ;;  %1105 = vmatpush3.bf16.msra.mxu1 %v1104_v16  ;;  %1123 = vmatpush3.bf16.msra.mxu0 %v1122_v35 }
 0x995   :  { %1164 = vlog2.f32 %v373_v43  ;;  %v406_v1 = vand.u32 2147483647, %v405_v44  ;;  %v438_v47 = vmul.f32 %v436_v46, %v433_v45  ;;  %1106 = vmatprep.subr.bf16.mxu1 %v1221_v0  ;;  %1124 = vmatprep.subr.bf16.mxu0 %v1221_v0  ;;  %v636_v43 = vld [vmem:[#allocation2 + $0x2c8] sm:$0xff]  ;;  %v637_v45 = vld [vmem:[#allocation2 + $0x2d0] sm:$0xff]  ;;  %v638_v46 = vld [vmem:[#allocation2 + $0x2d8] sm:$0xff] }
 0x996   :  { %v1131_v44 = vpack.c.bf16 %v636_v43, %v635_v42 }
 0x997   :  { %v407_v48 = vadd.f32 1e-08, %v406_v1  ;;  %v439_v49 = vadd.f32 1.0, %v438_v47  ;;  %v1134_v1 = vpack.c.bf16 %v638_v46, %v637_v45  ;;  %v639_v47 = vld [vmem:[#allocation2 + $0x2e0] sm:$0xff] }
 0x998   :  { %1108 = vmatpush3.bf16.msra.mxu1 %v1107_v19  ;;  %1126 = vmatpush3.bf16.msra.mxu0 %v1125_v38 }
 0x999   :  { %1166 = vlog2.f32 %v407_v48  ;;  %v440_v50 = vand.u32 2147483647, %v439_v49  ;;  %1109 = vmatprep.subr.bf16.mxu1 %v1221_v0  ;;  %1127 = vmatprep.subr.bf16.mxu0 %v1221_v0  ;;  %v640_v48 = vld [vmem:[#allocation2 + $0x2e8] sm:$0xff] }
 0x99a   :  { %v1137_v49 = vpack.c.bf16 %v640_v48, %v639_v47 }
 0x99b   :  { %v441_v51 = vadd.f32 1e-08, %v440_v50  ;;  %v1163_v52 = vpop.eup %1162  ;;  %v720_v50 = vand.u32 127, %v53_v10 }
 0x99c   :  { %v341_v54 = vmul.f32 0.6931472, %v1163_v52  ;;  %1111 = vmatpush3.bf16.msra.mxu1 %v1110_v22  ;;  %1129 = vmatpush3.bf16.msra.mxu0 %v1128_v41 }
 0x99d   :  { %1168 = vlog2.f32 %v441_v51  ;;  %1112 = vmatprep.subr.bf16.mxu1 %v1221_v0  ;;  %1130 = vmatprep.subr.bf16.mxu0 %v1221_v0  ;;  %vm721_vm2 = vcmp.eq.s32.totalorder %v720_v50, 32 }
 0x99f   :  { %v1165_v53 = vpop.eup %1164 }
 0x9a0   :  { %v375_v55 = vmul.f32 0.6931472, %v1165_v53  ;;  %1114 = vmatpush3.bf16.msra.mxu1 %v1113_v25  ;;  %1132 = vmatpush3.bf16.msra.mxu0 %v1131_v44  ;;  %v461_v53 = vrot.slane %v1311_v13, %v424_v5  ;;  %v645_v5 = vsub.s32 5, %v1305_v11 }
 0x9a1   :  { %1115 = vmatprep.subr.bf16.mxu1 %v1221_v0  ;;  %1133 = vmatprep.subr.bf16.mxu0 %v1221_v0 }
 0x9a2   :  { %v376_v56 = vadd.f32 %v375_v55, %v341_v54  ;;  %v646_v2 = vrot.slane %v1311_v13, %v645_v5 }
 0x9a3   :  { %v1167_v57 = vpop.eup %1166 }
 0x9a4   :  { %v409_v58 = vmul.f32 0.6931472, %v1167_v57  ;;  %1117 = vmatpush3.bf16.msra.mxu1 %v1116_v28  ;;  %1135 = vmatpush3.bf16.msra.mxu0 %v1134_v1 }
 0x9a5   :  { %1136 = vmatprep.subr.bf16.mxu0 %v1221_v0 }
 0x9a6   :  { %v410_v59 = vadd.f32 %v409_v58, %v376_v56  ;;  %v642_v58 = vld [vmem:[#allocation2 + $0x2f8] sm:$0xff] }
 0x9a7   :  { %v1169_v60 = vpop.eup %1168 }
 0x9a8   :  { %v443_v61 = vmul.f32 0.6931472, %v1169_v60  ;;  %1138 = vmatpush3.bf16.msra.mxu0 %v1137_v49 }
 0x9a9   :  { %1139 = vmatprep.subr.bf16.mxu0 %v1221_v0  ;;  %v641_v0 = vld [vmem:[#allocation2 + $0x2f0] sm:$0xff] }
 0x9aa   :  { %v444_v62 = vadd.f32 %v443_v61, %v410_v59  ;;  %v1140_v10 = vpack.c.bf16 %v642_v58, %v641_v0  ;;  %v554_v59 = vsub.s32 4, %v1305_v11 }
 0x9ac   :  { %724 = vperm.xlu0 %1153, %v444_v62   ;;  %1141 = vmatpush3.bf16.msra.mxu0 %v1140_v10 }
 0xa2b   :  { %v725_v51 = vpop.permute.xlu0 %724 }
 0xa2c   :  { %v727_v52 = vsel %vm721_vm2, %v725_v51, %v1324_v32  ;;  %v555_v32 = vrot.slane %v1311_v13, %v554_v59 }
 0xa2d   :  { %728 = vst [vmem:[%s1396_s5] sm:$0xff] %v727_v52  ;;  %s1227_s5 = smov [#allocation5]  }
 0xa2e   :  { %s735_s13 = sshll.u32 %s1227_s5, 4  ;;  %s736_s13 = int_to_ptr.vmem [resolvable:$true] %s735_s13 }
 0xa2f   :  { %s1192_s14 = scalar_lea.vmem %s736_s13, 128  ;;  %p1197_p9 = scmp.lt.s32.totalorder %s736_s13, %s736_s13 }
 0xa30   :  { %p1193_p8 = scmp.ne.s32.totalorder %s736_s13, %s1192_s14  ;;  %p1198_p10 = scmp.lt.s32.totalorder %s1192_s14, %s1192_s14 }
 0xa32   :  { %p1199_p11 = por %p1198_p10, %p1197_p9 }
 0xa34   :  { %p1200_p12 = pnand %p1199_p11, %p1193_p8 }
 0xa5a   :  { %v531_v54 = vpop.f32.mrb[2].mxu1 }
 0xa5b   :  { %v532_v55 = vadd.f32 %v531_v54, %v461_v53  ;;  %v948_v56 = vpop.f32.mrb[3].mxu1 }
 0xa5d   :  { %v535_v57 = vmax.f32 %v532_v55, 0.0 }
 0xa5f   :  { %982 = vmatmul.mubr.f32.vlgmr.msra.gmra.mrb[4].mxu1 %v535_v57 }
 0xb32   :  { %v622_v60 = vpop.f32.mrb[4].mxu1 }
 0xb33   :  { %v623_v61 = vadd.f32 %v622_v60, %v555_v32  ;;  %v983_v62 = vpop.f32.mrb[5].mxu1 }
 0xb35   :  { %v626_v63 = vmax.f32 %v623_v61, 0.0 }
 0xb37   :  { %1017 = vmatmul.mubr.f32.vlgmr.msra.gmra.mrb[4].mxu0 %v626_v63 }
 0xc0a   :  { %v713_v3 = vpop.f32.mrb[4].mxu0 }
 0xc0b   :  { %v714_v4 = vadd.f32 %v713_v3, %v646_v2  ;;  %v1018_v6 = vpop.f32.mrb[5].mxu0 }
 0xc0d   :  { %v717_v7 = vmax.f32 %v714_v4, 0.0 }
 0xc0f   :  { %718 = vst [vmem:[#allocation5] sm:$0xff] %v717_v7 }
 0xc10   :  { %1203 = shalt.err (!%p1200_p12)
}
 0xc11   :  { %s1204_s17 = scalar_lea.hbm %s1395_s4, 128 }
 0xc12   :  { %p1205_p13 = scmp.ne.s32.totalorder %s1395_s4, %s1204_s17  ;;  %p1208_p0 = scmp.lt.u32.totalorder %s1204_s17, %s1395_s4 }
 0xc14   :  { %p1210_p1 = pnand %p1208_p0, %p1205_p13 }
 0xc16   :  { %1213 = shalt.err (!%p1210_p1)
}
 0xc17   :  { %738 = dma.vmem_to_hbm [thread:$0]  %s736_s13, 128, %s1395_s4, [#allocation4]  }
 0xc18   :  { %1216 = dma.done.wait [#allocation4], 128  }
 0xc19   :  { %1217 = vsyncadd [#allocation4], 4294967168 }
 0xc1a   :  { %746 = vsyncpa [#allocation3], 1 }
 0xc1b   :  { %747 = vsyncpa [#allocation4], 1 }

</bundles_post_ra>
